<compile_context>
chip_gen: v5e
topology: v5e:2x2
jax: 0.10.0
libtpu: 0.0.40
codegen_flags: <defaults>
</compile_context>

<pallas_src>
import functools

import jax
import jax.numpy as jnp
from jax.experimental import pallas as pl
from jax.experimental.pallas import tpu as pltpu

LANES = 128
SUBLANES = 8                  # f32 sublanes per vreg
DEFAULT_SUB_CHUNK_ROWS = 512  # compute sub-chunk inside a block (512x128 f32 = 256 KiB)
DEFAULT_NUM_CORES = 2         # megacore-friendly default; surplus tiles are skipped elsewhere


def _cdiv(a, b):
    return -(-a // b)


def _num_tensorcores():
    """Best-effort TensorCore count per chip (v7x has 2). Falls back to 2."""
    try:
        info = pltpu.get_tpu_info()
    except Exception:
        return DEFAULT_NUM_CORES
    for attr in ("num_cores", "core_count", "num_tensorcores",
                 "tensor_core_count", "num_cores_per_chip"):
        v = getattr(info, attr, None)
        if isinstance(v, int) and 1 <= v <= 8:
            return v
    return DEFAULT_NUM_CORES


def _default_max_block_rows():
    """2 MiB f32 blocks by default; 4 MiB on chips with large (>=96 MiB) VMEM."""
    try:
        vmem = pltpu.get_tpu_info().vmem_capacity_bytes
    except Exception:
        return 4096
    return 8192 if vmem >= 96 * 1024 * 1024 else 4096


def _modulating_factor(d, gamma):
    """(1 - pt)**gamma; repeated multiplies for integer gamma (default 2.0)."""
    g = float(gamma)
    if g == 0.0:
        return jnp.ones_like(d)
    if g == int(g) and 1 <= int(g) <= 8:
        out = d
        for _ in range(int(g) - 1):
            out = out * d
        return out
    # TODO(synk): non-integer gamma lowers to exp(g*log(d)); d==0 yields 0 on TPU.
    return d ** g


def _focal_loss_kernel(x_ref, t_ref, o_ref, *, gamma, block_rows, chunk_rows,
                       n_tiles, tiles_per_core, has_surplus):
    c = pl.program_id(0)              # "parallel" core axis
    k = pl.program_id(1)              # sequential tile axis (accumulates into o_ref)
    t_idx = c * tiles_per_core + k    # global block index

    @pl.when(k == 0)
    def _init():
        o_ref[...] = jnp.zeros_like(o_ref)

    n_full = block_rows // chunk_rows           # static
    rem = block_rows - n_full * chunk_rows      # static, multiple of 8

    def accum(row0, nrows):
        # One compute sub-chunk: load, focal-loss math in f32, reduce across vregs
        # (pure VPU adds) into the VMEM-resident (1, 8, 128) output block.
        x = x_ref[pl.ds(row0, nrows), :].astype(jnp.float32)
        t = t_ref[pl.ds(row0, nrows), :].astype(jnp.float32)
        # Numerically stable BCE-with-logits (matches F.binary_cross_entropy_with_logits):
        #   loss = max(x, 0) - x*t + log1p(exp(-|x|))
        bce = jnp.maximum(x, 0.0) - x * t + jnp.log1p(jnp.exp(-jnp.abs(x)))
        pt = jnp.exp(-bce)
        f = _modulating_factor(1.0 - pt, gamma) * bce   # alpha applied once, outside
        o_ref[...] += f.reshape(1, -1, SUBLANES, LANES).sum(axis=1)

    def compute_block():
        if n_full == 1 and rem == 0:
            accum(0, chunk_rows)
        else:
            @pl.loop(0, n_full)
            def _chunks(ci):
                accum(pl.multiple_of(ci * chunk_rows, chunk_rows), chunk_rows)
            if rem:
                accum(n_full * chunk_rows, rem)

    if has_surplus:
        # Surplus (clamped duplicate) tiles past the real tile count contribute
        # nothing; skip their compute entirely.
        pl.when(t_idx < n_tiles)(compute_block)
    else:
        compute_block()


def _focal_loss_impl(inputs, targets, alpha=0.25, gamma=2.0, *,
                     max_block_rows=None, sub_chunk_rows=DEFAULT_SUB_CHUNK_ROWS,
                     num_cores=None):
    n = inputs.size
    gamma = float(gamma)

    # Targets keep their native dtype end-to-end (no full-size up-cast copy in HBM);
    # bool -> int8 only (same byte width) to keep loads on a packed integer path.
    if targets.dtype == jnp.bool_:
        targets = targets.astype(jnp.int8)

    x_flat = inputs.reshape(-1)
    t_flat = targets.reshape(-1)

    # Packed-sublane alignment for the narrowest operand dtype (8/16/32 rows).
    min_itemsize = min(4, x_flat.dtype.itemsize, t_flat.dtype.itemsize)
    row_align = SUBLANES * (4 // min_itemsize)

    rows2d = n // LANES
    total = jnp.zeros((), jnp.float32)
    rows_kernel = 0

    if rows2d >= row_align:
        # Lane-dense 2-D view.  Zero-copy when numel % 128 == 0 (the common case);
        # otherwise XLA materializes the 128-aligned prefix slice once.
        main = rows2d * LANES
        xp = x_flat if main == n else x_flat[:main]
        tp = t_flat if main == n else t_flat[:main]
        x2d = xp.reshape(rows2d, LANES)
        t2d = tp.reshape(rows2d, LANES)

        if max_block_rows is None:
            max_block_rows = _default_max_block_rows()
        # "Balanced" block size <= max_block_rows so only fully in-bounds blocks are
        # visited and the leftover row remainder stays tiny.
        n_split = _cdiv(rows2d, max_block_rows)
        block_rows = max(row_align, (_cdiv(rows2d, n_split) // row_align) * row_align)
        block_rows = min(block_rows, rows2d)
        n_tiles = rows2d // block_rows
        rows_kernel = n_tiles * block_rows

        chunk_rows = max(SUBLANES,
                         (min(sub_chunk_rows, block_rows) // SUBLANES) * SUBLANES)

        n_cores = num_cores if num_cores is not None else _num_tensorcores()
        n_cores = max(1, min(n_cores, n_tiles))
        tiles_per_core = _cdiv(n_tiles, n_cores)
        has_surplus = n_cores * tiles_per_core != n_tiles

        def in_index_map(c, k):
            # Surplus tiles (only when n_tiles % n_cores != 0) re-read the last
            # valid block; the kernel skips their compute entirely.
            return (jnp.minimum(c * tiles_per_core + k, n_tiles - 1), 0)

        kernel = functools.partial(
            _focal_loss_kernel, gamma=gamma, block_rows=block_rows,
            chunk_rows=chunk_rows, n_tiles=n_tiles,
            tiles_per_core=tiles_per_core, has_surplus=has_surplus)

        cost = pl.CostEstimate(
            flops=10 * rows_kernel * LANES,
            transcendentals=3 * rows_kernel * LANES,
            bytes_accessed=rows_kernel * LANES
            * (x2d.dtype.itemsize + t2d.dtype.itemsize)
            + n_cores * SUBLANES * LANES * 4)

        in_bytes = 2 * block_rows * LANES * (x2d.dtype.itemsize + t2d.dtype.itemsize)
        vmem_limit = min(100 * 1024 * 1024, in_bytes + 16 * 1024 * 1024)

        partials = pl.pallas_call(
            kernel,
            out_shape=jax.ShapeDtypeStruct((n_cores, SUBLANES, LANES), jnp.float32),
            grid_spec=pltpu.PrefetchScalarGridSpec(
                num_scalar_prefetch=0,
                grid=(n_cores, tiles_per_core),
                in_specs=[pl.BlockSpec((block_rows, LANES), in_index_map),
                          pl.BlockSpec((block_rows, LANES), in_index_map)],
                out_specs=pl.BlockSpec((1, SUBLANES, LANES), lambda c, k: (c, 0, 0)),
            ),
            compiler_params=pltpu.CompilerParams(
                dimension_semantics=("parallel", "arbitrary"),
                vmem_limit_bytes=vmem_limit,
            ),
            cost_estimate=cost,
        )(x2d, t2d)
        total = total + jnp.sum(partials)

    # Remainder (rows not covered by full blocks + the sub-128 ragged tail):
    # always < one block + 128 elements; one tiny fused XLA reduction.
    tail_start = rows_kernel * LANES
    if tail_start < n:
        xt = x_flat[tail_start:].astype(jnp.float32)
        tt = t_flat[tail_start:].astype(jnp.float32)
        bce = jnp.maximum(xt, 0.0) - xt * tt + jnp.log1p(jnp.exp(-jnp.abs(xt)))
        pt = jnp.exp(-bce)
        total = total + jnp.sum(_modulating_factor(1.0 - pt, gamma) * bce)

    # reduction='mean', with alpha folded into the final scale (saves a per-element mul).
    return total * jnp.float32(alpha) / jnp.float32(n)


@functools.partial(jax.jit, static_argnames=("alpha", "gamma"))
def focal_loss(inputs, targets, alpha=0.25, gamma=2.0):
    """FocalLoss.forward with the module's default reduction='mean'."""
    return _focal_loss_impl(inputs, targets, alpha, gamma)


def _focal_loss_ref(inputs, targets, alpha=0.25, gamma=2.0):
    x = inputs.astype(jnp.float32)
    t = targets.astype(jnp.float32)
    bce = jnp.maximum(x, 0.0) - x * t + jnp.log1p(jnp.exp(-jnp.abs(x)))
    pt = jnp.exp(-bce)
    return jnp.mean(alpha * (1.0 - pt) ** gamma * bce)


if __name__ == "__main__":
    key = jax.random.PRNGKey(0)
    k1, k2, k3, k4, k5, k6, k7, k8 = jax.random.split(key, 8)

    # 1) NCHW logits / 0-1 float targets (numel % 128 == 0: fully zero-copy path).
    shape1 = (2, 4, 16, 16)
    x1 = jax.random.normal(k1, shape1, dtype=jnp.float32)
    t1 = (jax.random.uniform(k2, shape1) > 0.5).astype(jnp.float32)
    out1 = jax.block_until_ready(focal_loss(x1, t1))
    ref1 = _focal_loss_ref(x1, t1)
    assert jnp.allclose(out1, ref1, rtol=1e-5, atol=1e-6), (out1, ref1)

    # 2) Ragged element count (1155): kernel on the 128-aligned prefix + jnp tail.
    shape2 = (3, 5, 77)
    x2 = jax.random.normal(k3, shape2, dtype=jnp.float32)
    t2 = (jax.random.uniform(k4, shape2) > 0.5).astype(jnp.float32)
    out2 = jax.block_until_ready(focal_loss(x2, t2))
    ref2 = _focal_loss_ref(x2, t2)
    assert jnp.allclose(out2, ref2, rtol=1e-5, atol=1e-6), (out2, ref2)

    # 3) Native bool targets travel to the kernel as int8 (no f32 up-cast copy).
    shape3 = (4, 8, 16, 16)
    x3 = jax.random.normal(k5, shape3, dtype=jnp.float32)
    t3 = jax.random.uniform(k6, shape3) > 0.5
    out3 = jax.block_until_ready(focal_loss(x3, t3))
    ref3 = _focal_loss_ref(x3, t3)
    assert jnp.allclose(out3, ref3, rtol=1e-5, atol=1e-6), (out3, ref3)

    # 4) Multi-tile path with small overrides: exercises the balanced block choice,
    #    per-core accumulation, sub-chunk pl.loop + remainder chunk, surplus-tile
    #    skip, and the row-remainder tail.
    shape4 = (1, 5, 40, 128)
    x4 = jax.random.normal(k7, shape4, dtype=jnp.float32)
    t4 = (jax.random.uniform(k8, shape4) > 0.5).astype(jnp.float32)
    out4 = jax.block_until_ready(
        _focal_loss_impl(x4, t4, 0.25, 2.0,
                         max_block_rows=64, sub_chunk_rows=32, num_cores=3))
    ref4 = _focal_loss_ref(x4, t4)
    assert jnp.allclose(out4, ref4, rtol=1e-5, atol=1e-6), (out4, ref4)

    print("KERNEL_OK")
</pallas_src>

<mosaic_0001>
module attributes {stable_mosaic.version = 11 : i64} {
  func.func @_focal_loss_kernel(%arg0: i32, %arg1: i32, %arg2: memref<16x128xf32, #tpu.memory_space<vmem>>, %arg3: memref<16x128xf32, #tpu.memory_space<vmem>>, %arg4: memref<1x8x128xf32, #tpu.memory_space<vmem>>) attributes {dimension_semantics = [#tpu.dimension_semantics<parallel>, #tpu.dimension_semantics<arbitrary>], iteration_bounds = array<i64: 1, 1>, scalar_prefetch = 0 : i64, scratch_operands = 0 : i64, tpu.core_type = #tpu.core_type<tc>, window_params = [{transform_indices = @transform_0, window_bounds = array<i64: 16, 128>}, {transform_indices = @transform_1, window_bounds = array<i64: 16, 128>}, {transform_indices = @transform_2, window_bounds = array<i64: 1, 8, 128>}]} {
    %c0_i32 = arith.constant 0 : i32
    %0 = arith.cmpi eq, %arg1, %c0_i32 : i32
    %1 = arith.extui %0 : i1 to i32
    %c0_i32_0 = arith.constant 0 : i32
    %2 = arith.cmpi ne, %1, %c0_i32_0 : i32
    scf.if %2 {
      %cst_14 = arith.constant 0.000000e+00 : f32
      %27 = vector.broadcast %cst_14 : f32 to vector<1x8x128xf32>
      %c0_15 = arith.constant 0 : index
      %c0_16 = arith.constant 0 : index
      %c0_17 = arith.constant 0 : index
      %28 = vector.load %arg4[%c0_15, %c0_16, %c0_17] : memref<1x8x128xf32, #tpu.memory_space<vmem>>, vector<1x8x128xf32>
      tpu.vector_store %arg4[%c0_15, %c0_16, %c0_17], %27 {strides = array<i32>} : memref<1x8x128xf32, #tpu.memory_space<vmem>>, vector<1x8x128xf32>,
    } else {
    }
    %c0 = arith.constant 0 : index
    %c0_1 = arith.constant 0 : index
    %3 = vector.load %arg2[%c0, %c0_1] : memref<16x128xf32, #tpu.memory_space<vmem>>, vector<16x128xf32>
    %c0_2 = arith.constant 0 : index
    %c0_3 = arith.constant 0 : index
    %4 = vector.load %arg3[%c0_2, %c0_3] : memref<16x128xf32, #tpu.memory_space<vmem>>, vector<16x128xf32>
    %cst = arith.constant 0.000000e+00 : f32
    %5 = vector.broadcast %cst : f32 to vector<16x128xf32>
    %6 = arith.maximumf %3, %5 : vector<16x128xf32>
    %7 = arith.mulf %3, %4 : vector<16x128xf32>
    %8 = arith.subf %6, %7 : vector<16x128xf32>
    %9 = math.absf %3 : vector<16x128xf32>
    %cst_4 = arith.constant 0.000000e+00 : f32
    %10 = vector.broadcast %cst_4 : f32 to vector<16x128xf32>
    %11 = arith.subf %10, %9 : vector<16x128xf32>
    %12 = math.exp %11 : vector<16x128xf32>
    %13 = math.log1p %12 : vector<16x128xf32>
    %14 = arith.addf %8, %13 : vector<16x128xf32>
    %cst_5 = arith.constant 0.000000e+00 : f32
    %15 = vector.broadcast %cst_5 : f32 to vector<16x128xf32>
    %16 = arith.subf %15, %14 : vector<16x128xf32>
    %17 = math.exp %16 : vector<16x128xf32>
    %cst_6 = arith.constant 1.000000e+00 : f32
    %18 = vector.broadcast %cst_6 : f32 to vector<16x128xf32>
    %19 = arith.subf %18, %17 : vector<16x128xf32>
    %20 = arith.mulf %19, %19 : vector<16x128xf32>
    %21 = arith.mulf %20, %14 : vector<16x128xf32>
    %c0_7 = arith.constant 0 : index
    %c0_8 = arith.constant 0 : index
    %c0_9 = arith.constant 0 : index
    %22 = vector.load %arg4[%c0_7, %c0_8, %c0_9] : memref<1x8x128xf32, #tpu.memory_space<vmem>>, vector<1x8x128xf32>
    %23 = vector.shape_cast %21 : vector<16x128xf32> to vector<1x2x8x128xf32>
    %cst_10 = arith.constant dense<0.000000e+00> : vector<1x8x128xf32>
    %24 = vector.multi_reduction <add>, %23, %cst_10 [1] : vector<1x2x8x128xf32> to vector<1x8x128xf32>
    %25 = arith.addf %22, %24 : vector<1x8x128xf32>
    %c0_11 = arith.constant 0 : index
    %c0_12 = arith.constant 0 : index
    %c0_13 = arith.constant 0 : index
    %26 = vector.load %arg4[%c0_11, %c0_12, %c0_13] : memref<1x8x128xf32, #tpu.memory_space<vmem>>, vector<1x8x128xf32>
    tpu.vector_store %arg4[%c0_11, %c0_12, %c0_13], %25 {strides = array<i32>} : memref<1x8x128xf32, #tpu.memory_space<vmem>>, vector<1x8x128xf32>,
    return
  }
  func.func @transform_0(%arg0: i32, %arg1: i32) -> (i32, i32) {
    %c1_i32 = arith.constant 1 : i32
    %0 = arith.muli %arg0, %c1_i32 : i32
    %1 = arith.addi %0, %arg1 : i32
    %c0_i32 = arith.constant 0 : i32
    %2 = arith.minsi %1, %c0_i32 : i32
    %c0_i32_0 = arith.constant 0 : i32
    %c0_i32_1 = arith.constant 0 : i32
    return %2, %c0_i32_0 : i32, i32
  }
  func.func @transform_1(%arg0: i32, %arg1: i32) -> (i32, i32) {
    %c1_i32 = arith.constant 1 : i32
    %0 = arith.muli %arg0, %c1_i32 : i32
    %1 = arith.addi %0, %arg1 : i32
    %c0_i32 = arith.constant 0 : i32
    %2 = arith.minsi %1, %c0_i32 : i32
    %c0_i32_0 = arith.constant 0 : i32
    %c0_i32_1 = arith.constant 0 : i32
    return %2, %c0_i32_0 : i32, i32
  }
  func.func @transform_2(%arg0: i32, %arg1: i32) -> (i32, i32, i32) {
    %c0_i32 = arith.constant 0 : i32
    %c0_i32_0 = arith.constant 0 : i32
    %c0_i32_1 = arith.constant 0 : i32
    return %arg0, %c0_i32, %c0_i32_0 : i32, i32, i32
  }
}

</mosaic_0001>

<bundles_post_ra>
// kernel: focal_loss.1
= control target key start
LH: loop header
LB: loop body
LE: loop exit
PB: predicated region body
PF: predicated region fallthrough
CT: control target
= control target key end

     0   :  { %s193_s0 = inlined_call_operand.vmem [shape: f32[16,128], index: 0, kind: input, shape index: {}]   ;;  %s194_s1 = inlined_call_operand.vmem [shape: f32[16,128], index: 1, kind: input, shape index: {}]   ;;  %s195_s2 = inlined_call_operand.vmem [shape: f32[1,8,128], index: 2, kind: output, shape index: {}]  }
   0x1   :  { %v80_v0 = vld [vmem:[%s193_s0] sm:$0xff]  ;;  %v81_v1 = vld [vmem:[%s193_s0 + $0x8] sm:$0xff] }
   0x2   :  { %v90_v2 = vand.u32 2147483647, %v80_v0  ;;  %v91_v3 = vand.u32 2147483647, %v81_v1  ;;  %v82_v12 = vld [vmem:[%s194_s1] sm:$0xff]  ;;  %v83_v15 = vld [vmem:[%s194_s1 + $0x8] sm:$0xff] }
   0x3   :  { %v84_v17 = vmax.f32 %v80_v0, 0.0  ;;  %v86_v18 = vmul.f32 %v82_v12, %v80_v0  ;;  %v85_v21 = vmax.f32 %v81_v1, 0.0  ;;  %v87_v22 = vmul.f32 %v83_v15, %v81_v1 }
   0x4   :  { %v92_v4 = vsub.f32 0.0, %v90_v2  ;;  %v93_v5 = vsub.f32 0.0, %v91_v3 }
   0x5   :  { %v88_v26 = vsub.f32 %v84_v17, %v86_v18  ;;  %v89_v29 = vsub.f32 %v85_v21, %v87_v22 }
   0x6   :  { %v94_v6 = vmul.f32 1.442695, %v92_v4  ;;  %v96_v7 = vmul.f32 1.442695, %v93_v5 }
   0x8   :  { %151 = vpow2.f32 %v94_v6 }
   0x9   :  { %153 = vpow2.f32 %v96_v7 }
   0xe   :  { %v152_v8 = vpop.eup %151 }
   0xf   :  { %v154_v9 = vpop.eup %153  ;;  %v98_v10 = vadd.f32 1.0, %v152_v8  ;;  %v101_v11 = vmul.f32 -0.5, %v152_v8  ;;  %v104_v19 = vand.u32 2147483647, %v152_v8 }
  0x10   :  { %v107_v13 = vadd.f32 1.0, %v154_v9  ;;  %v110_v14 = vmul.f32 -0.5, %v154_v9  ;;  %v113_v23 = vand.u32 2147483647, %v154_v9 }
  0x11   :  { %155 = vlog2.f32 %v98_v10  ;;  %v102_v16 = vadd.f32 1.0, %v101_v11  ;;  %vm105_vm0 = vcmp.lt.f32.partialorder %v104_v19, 0.0004427343 }
  0x12   :  { %157 = vlog2.f32 %v107_v13  ;;  %v111_v20 = vadd.f32 1.0, %v110_v14  ;;  %vm114_vm1 = vcmp.lt.f32.partialorder %v113_v23, 0.0004427343 }
  0x13   :  { %v103_v24 = vmul.f32 %v152_v8, %v102_v16 }
  0x14   :  { %v112_v27 = vmul.f32 %v154_v9, %v111_v20 }
  0x17   :  { %v156_v25 = vpop.eup %155 }
  0x18   :  { %v158_v28 = vpop.eup %157  ;;  %v100_v30 = vmul.f32 0.6931472, %v156_v25 }
  0x19   :  { %v109_v31 = vmul.f32 0.6931472, %v158_v28 }
  0x1a   :  { %v106_v32 = vsel %vm105_vm0, %v103_v24, %v100_v30 }
  0x1b   :  { %v115_v33 = vsel %vm114_vm1, %v112_v27, %v109_v31  ;;  %v116_v34 = vadd.f32 %v106_v32, %v88_v26 }
  0x1c   :  { %v117_v35 = vadd.f32 %v115_v33, %v89_v29 }
  0x1d   :  { %v118_v36 = vsub.f32 0.0, %v116_v34 }
  0x1e   :  { %v119_v37 = vsub.f32 0.0, %v117_v35 }
  0x1f   :  { %v120_v38 = vmul.f32 1.442695, %v118_v36 }
  0x20   :  { %v122_v39 = vmul.f32 1.442695, %v119_v37 }
  0x21   :  { %159 = vpow2.f32 %v120_v38 }
  0x22   :  { %161 = vpow2.f32 %v122_v39 }
  0x27   :  { %v160_v40 = vpop.eup %159 }
  0x28   :  { %v162_v41 = vpop.eup %161  ;;  %v124_v42 = vsub.f32 1.0, %v160_v40 }
  0x29   :  { %v125_v43 = vsub.f32 1.0, %v162_v41 }
  0x2a   :  { %v126_v44 = vmul.f32 %v124_v42, %v124_v42 }
  0x2b   :  { %v127_v45 = vmul.f32 %v125_v43, %v125_v43 }
  0x2c   :  { %v128_v46 = vmul.f32 %v126_v44, %v116_v34 }
  0x2d   :  { %v129_v47 = vmul.f32 %v127_v45, %v117_v35 }
  0x2f   :  { %v131_v48 = vadd.f32 %v129_v47, %v128_v46 }
  0x31   :  { %133 = vst [vmem:[%s195_s2] sm:$0xff] %v131_v48 }

</bundles_post_ra>
